<compile_context>
chip_gen: v6e
topology: v6e:2x2x1
jax: 0.10.0
libtpu: 0.0.40
codegen_flags: <defaults>
</compile_context>

<pallas_src>
import functools

import numpy as np
import jax
import jax.numpy as jnp
from jax import lax
from jax.experimental import pallas as pl
from jax.experimental.pallas import tpu as pltpu


def _prediction_kernel(bt, P, enc_ref, tpre_ref, wvt_ref, we_ref, bec_ref,
                       wvrmt_ref, bvrm_ref, out_ref):
    """One batch-block (bt batches) per grid step.

    enc_ref   : (bt*P, D)  encoder features, batches stacked along rows
    tpre_ref  : (P, D)     batch-invariant  W0 @ E + b0 + bv  (precomputed, f32)
    wvt_ref   : (D, D)     Wv^T
    we_ref    : (N, D)     We (un-transposed; contracted on D by dot_general)
    bec_ref   : (N, 1)     be as a column (f32)
    wvrmt_ref : (D, Cp)    Wvrm^T zero-padded to Cp (multiple of 128) lanes
    bvrm_ref  : (1, Cp)    bvrm zero-padded (f32)
    out_ref   : (bt*N, Cp) lane-dense output block
    """
    N = we_ref.shape[0]
    cdt = enc_ref.dtype                      # MXU operand dtype (f32 or bf16)

    enc2 = enc_ref[...]                      # (bt*P, D)
    tpre = tpre_ref[...]                     # (P, D)  f32
    we = we_ref[...]                         # (N, D)
    bec = bec_ref[...]                       # (N, 1)  f32

    # Wv projection for the whole batch block in one MXU call (bt*P rows).
    v2 = jnp.dot(enc2, wvt_ref[...], preferred_element_type=jnp.float32)   # (bt*P, D)

    g_rows = []
    for b in range(bt):                      # small, fully unrolled
        v_b = v2[b * P:(b + 1) * P, :]                        # (P, D) f32
        t_b = jnp.tanh(tpre + v_b)                            # (P, D) f32
        # scores directly as (N, P): contract both operands on D -> no transpose
        s_b = lax.dot_general(
            we, t_b.astype(cdt),
            dimension_numbers=(((1,), (1,)), ((), ())),
            preferred_element_type=jnp.float32) + bec         # (N, P)
        # softmax over positions (last axis)
        m = jnp.max(s_b, axis=-1, keepdims=True)
        e = jnp.exp(s_b - m)
        inv = pl.reciprocal(jnp.sum(e, axis=-1, keepdims=True), approx=True)
        attn = e * inv                                        # (N, P)
        enc_b = enc2[b * P:(b + 1) * P, :]                    # (P, D)
        g_b = jnp.dot(attn.astype(cdt), enc_b,
                      preferred_element_type=jnp.float32)     # (N, D)
        g_rows.append(g_b)

    g2 = g_rows[0] if bt == 1 else jnp.concatenate(g_rows, axis=0)          # (bt*N, D)
    out = jnp.dot(g2.astype(cdt), wvrmt_ref[...],
                  preferred_element_type=jnp.float32) + bvrm_ref[...]       # (bt*N, Cp)
    out_ref[...] = out.astype(out_ref.dtype)


def prediction_forward(enc, params, *, mxu_dtype=None, batch_block=None):
    """enc: (B, P, D).  Returns (B, N, C) matching the PyTorch forward.

    mxu_dtype   : e.g. jnp.bfloat16 to cast MXU operands only (v6e/v7x).
    batch_block : batches per grid step; default = whole batch in one step.
                  (For very large B pass a divisor of B to bound unrolling.)
    """
    B, P, D = enc.shape
    out_dtype = enc.dtype
    emb = params["f0_embedding"]                    # (N, D)
    w0, b0 = params["w0_w"], params["w0_b"]         # (P, N), (P,)
    wv, bv = params["wv_w"], params["wv_b"]         # (D, D), (D,)
    we, be = params["we_w"], params["we_b"]         # (N, D), (N,)
    wvrm, bvrm = params["wvrm_w"], params["wvrm_b"]  # (C, D), (C,)
    N = emb.shape[0]
    C = wvrm.shape[0]

    # Batch-invariant position prompt computed ONCE (also folds the wv bias):
    #   tpre = W0 @ E + b0[:, None] + bv[None, :]      -> (P, D)
    tpre = (jnp.dot(w0, emb) + b0[:, None] + bv[None, :]).astype(jnp.float32)

    # Pre-transpose / zero-pad weights so the kernel does plain row-major
    # matmuls and the output block is lane-dense (Cp lanes, unmasked stores).
    Cp = ((C + 127) // 128) * 128
    wvt = wv.T                                                       # (D, D)
    wvrmt = jnp.zeros((D, Cp), wvrm.dtype).at[:, :C].set(wvrm.T)     # (D, Cp)
    bvrm_p = jnp.zeros((1, Cp), jnp.float32).at[:, :C].set(bvrm.astype(jnp.float32))
    bec = be.astype(jnp.float32).reshape(N, 1)

    if mxu_dtype is not None:        # bf16 MXU operands; f32 accumulation & math
        enc = enc.astype(mxu_dtype)
        wvt = wvt.astype(mxu_dtype)
        we = we.astype(mxu_dtype)
        wvrmt = wvrmt.astype(mxu_dtype)

    bt = B if batch_block is None else batch_block
    assert B % bt == 0, "batch_block must divide B"
    n_blocks = B // bt

    enc2d = enc.reshape(B * P, D)    # metadata-only reshape outside the kernel

    const2 = lambda i: (0, 0)
    grid_spec = pltpu.PrefetchScalarGridSpec(
        num_scalar_prefetch=0,
        grid=(n_blocks,),
        in_specs=[
            pl.BlockSpec((bt * P, D), lambda i: (i, 0)),   # enc (stacked rows)
            pl.BlockSpec((P, D), const2),                  # tpre (batch-invariant)
            pl.BlockSpec((D, D), const2),                  # Wv^T
            pl.BlockSpec((N, D), const2),                  # We
            pl.BlockSpec((N, 1), const2),                  # be column
            pl.BlockSpec((D, Cp), const2),                 # Wvrm^T (padded)
            pl.BlockSpec((1, Cp), const2),                 # bvrm (padded)
        ],
        out_specs=pl.BlockSpec((bt * N, Cp), lambda i: (i, 0)),
    )

    out_padded = pl.pallas_call(
        functools.partial(_prediction_kernel, bt, P),
        out_shape=jax.ShapeDtypeStruct((B * N, Cp), out_dtype),
        grid_spec=grid_spec,
        compiler_params=pltpu.CompilerParams(
            dimension_semantics=("parallel",) if n_blocks > 1 else ("arbitrary",)),
    )(enc2d, tpre, wvt, we, bec, wvrmt, bvrm_p)

    return out_padded[:, :C].reshape(B, N, C)


def prediction_reference(enc, params):
    """Pure-JAX reference mirroring the PyTorch forward (f32)."""
    emb = params["f0_embedding"]                      # (N, D)
    t0 = emb.T @ params["w0_w"].T + params["w0_b"]    # (D, P)
    t0 = t0.T                                         # (P, D)
    v = enc @ params["wv_w"].T + params["wv_b"]       # (B, P, D)
    t = jnp.tanh(t0[None] + v)
    s = t @ params["we_w"].T + params["we_b"]         # (B, P, N)
    attn = jax.nn.softmax(jnp.transpose(s, (0, 2, 1)), axis=2)  # (B, N, P)
    g = jnp.einsum("bnp,bpd->bnd", attn, enc)
    return g @ params["wvrm_w"].T + params["wvrm_b"]  # (B, N, C)


def init_params(key, n_dim, n_class, n_max_char, n_position):
    ks = jax.random.split(key, 9)
    s = 0.05
    return {
        "f0_embedding": jax.random.normal(ks[0], (n_max_char, n_dim), jnp.float32) * s,
        "w0_w": jax.random.normal(ks[1], (n_position, n_max_char), jnp.float32) * s,
        "w0_b": jax.random.normal(ks[2], (n_position,), jnp.float32) * s,
        "wv_w": jax.random.normal(ks[3], (n_dim, n_dim), jnp.float32) * s,
        "wv_b": jax.random.normal(ks[4], (n_dim,), jnp.float32) * s,
        "we_w": jax.random.normal(ks[5], (n_max_char, n_dim), jnp.float32) * s,
        "we_b": jax.random.normal(ks[6], (n_max_char,), jnp.float32) * s,
        "wvrm_w": jax.random.normal(ks[7], (n_class, n_dim), jnp.float32) * s,
        "wvrm_b": jax.random.normal(ks[8], (n_class,), jnp.float32) * s,
    }


if __name__ == "__main__":
    # Small shapes consistent with the module: B=2, n_position=16, n_dim=32,
    # N_max_character=8, n_class=16  (N*C = 128 -> lane-dense output slab).
    B, P, D, N, C = 2, 16, 32, 8, 16

    key = jax.random.PRNGKey(0)
    k_enc, k_par = jax.random.split(key)
    enc = jax.random.normal(k_enc, (B, P, D), jnp.float32)
    params = init_params(k_par, n_dim=D, n_class=C, n_max_char=N, n_position=P)

    ref = jax.block_until_ready(prediction_reference(enc, params))

    # f32 MXU-operand path (exact up to the approximate EUP reciprocal).
    out = jax.block_until_ready(prediction_forward(enc, params))
    assert out.shape == (B, N, C)
    np.testing.assert_allclose(np.asarray(out), np.asarray(ref), rtol=1e-2, atol=1e-2)

    # bf16 MXU-operand path (v6e/v7x optimization); f32 accumulation & softmax.
    out_bf16 = jax.block_until_ready(
        prediction_forward(enc, params, mxu_dtype=jnp.bfloat16))
    np.testing.assert_allclose(np.asarray(out_bf16), np.asarray(ref),
                               rtol=5e-2, atol=5e-2)

    print("KERNEL_OK")
</pallas_src>

<mosaic_0001>
module attributes {stable_mosaic.version = 11 : i64} {
  func.func @_prediction_kernel(%arg0: i32, %arg1: memref<32x32xf32, #tpu.memory_space<vmem>>, %arg2: memref<16x32xf32, #tpu.memory_space<vmem>>, %arg3: memref<32x32xf32, #tpu.memory_space<vmem>>, %arg4: memref<8x32xf32, #tpu.memory_space<vmem>>, %arg5: memref<8x1xf32, #tpu.memory_space<vmem>>, %arg6: memref<32x128xf32, #tpu.memory_space<vmem>>, %arg7: memref<1x128xf32, #tpu.memory_space<vmem>>, %arg8: memref<16x128xf32, #tpu.memory_space<vmem>>) attributes {dimension_semantics = [#tpu.dimension_semantics<arbitrary>], iteration_bounds = array<i64: 1>, scalar_prefetch = 0 : i64, scratch_operands = 0 : i64, tpu.core_type = #tpu.core_type<tc>, window_params = [{transform_indices = @transform_0, window_bounds = array<i64: 32, 32>}, {pipeline_mode = #tpu.pipeline_mode<synchronous>, transform_indices = @transform_1, window_bounds = array<i64: 16, 32>}, {pipeline_mode = #tpu.pipeline_mode<synchronous>, transform_indices = @transform_2, window_bounds = array<i64: 32, 32>}, {pipeline_mode = #tpu.pipeline_mode<synchronous>, transform_indices = @transform_3, window_bounds = array<i64: 8, 32>}, {pipeline_mode = #tpu.pipeline_mode<synchronous>, transform_indices = @transform_4, window_bounds = array<i64: 8, 1>}, {pipeline_mode = #tpu.pipeline_mode<synchronous>, transform_indices = @transform_5, window_bounds = array<i64: 32, 128>}, {pipeline_mode = #tpu.pipeline_mode<synchronous>, transform_indices = @transform_6, window_bounds = array<i64: 1, 128>}, {transform_indices = @transform_7, window_bounds = array<i64: 16, 128>}]} {
    %c0 = arith.constant 0 : index
    %c0_0 = arith.constant 0 : index
    %0 = vector.load %arg1[%c0, %c0_0] : memref<32x32xf32, #tpu.memory_space<vmem>>, vector<32x32xf32>
    %c0_1 = arith.constant 0 : index
    %c0_2 = arith.constant 0 : index
    %1 = vector.load %arg2[%c0_1, %c0_2] : memref<16x32xf32, #tpu.memory_space<vmem>>, vector<16x32xf32>
    %c0_3 = arith.constant 0 : index
    %c0_4 = arith.constant 0 : index
    %2 = vector.load %arg4[%c0_3, %c0_4] : memref<8x32xf32, #tpu.memory_space<vmem>>, vector<8x32xf32>
    %c0_5 = arith.constant 0 : index
    %c0_6 = arith.constant 0 : index
    %3 = vector.load %arg5[%c0_5, %c0_6] : memref<8x1xf32, #tpu.memory_space<vmem>>, vector<8x1xf32>
    %c0_7 = arith.constant 0 : index
    %c0_8 = arith.constant 0 : index
    %4 = vector.load %arg3[%c0_7, %c0_8] : memref<32x32xf32, #tpu.memory_space<vmem>>, vector<32x32xf32>
    %cst = arith.constant dense<0.000000e+00> : vector<32x32xf32>
    %5 = tpu.matmul %0, %4, %cst {dimension_numbers = #tpu.dot_dimension_numbers<[1], [0], [0], [1], [0, 0, 1, 1], [], []>} : vector<32x32xf32>, vector<32x32xf32>, vector<32x32xf32> -> vector<32x32xf32>
    %6 = vector.extract_strided_slice %5 {offsets = [0, 0], sizes = [16, 32], strides = [1, 1]} : vector<32x32xf32> to vector<16x32xf32>
    %7 = arith.addf %1, %6 : vector<16x32xf32>
    %8 = math.tanh %7 : vector<16x32xf32>
    %cst_9 = arith.constant dense<0.000000e+00> : vector<8x16xf32>
    %9 = tpu.matmul %2, %8, %cst_9 {dimension_numbers = #tpu.dot_dimension_numbers<[1], [1], [0], [0], [0, 0, 1, 0], [], []>} : vector<8x32xf32>, vector<16x32xf32>, vector<8x16xf32> -> vector<8x16xf32>
    %10 = vector.broadcast %3 : vector<8x1xf32> to vector<8x16xf32>
    %11 = arith.addf %9, %10 : vector<8x16xf32>
    %cst_10 = arith.constant dense<0xFF800000> : vector<8xf32>
    %12 = vector.multi_reduction <maximumf>, %11, %cst_10 [1] : vector<8x16xf32> to vector<8xf32>
    %13 = vector.shape_cast %12 : vector<8xf32> to vector<8x1xf32>
    %14 = vector.broadcast %13 : vector<8x1xf32> to vector<8x16xf32>
    %15 = arith.subf %11, %14 : vector<8x16xf32>
    %16 = math.exp %15 : vector<8x16xf32>
    %cst_11 = arith.constant dense<0.000000e+00> : vector<8xf32>
    %17 = vector.multi_reduction <add>, %16, %cst_11 [1] : vector<8x16xf32> to vector<8xf32>
    %18 = vector.shape_cast %17 : vector<8xf32> to vector<8x1xf32>
    %19 = tpu.reciprocal %18 {approx = true} : vector<8x1xf32> -> vector<8x1xf32>
    %20 = vector.broadcast %19 : vector<8x1xf32> to vector<8x16xf32>
    %21 = arith.mulf %16, %20 : vector<8x16xf32>
    %22 = vector.extract_strided_slice %0 {offsets = [0, 0], sizes = [16, 32], strides = [1, 1]} : vector<32x32xf32> to vector<16x32xf32>
    %cst_12 = arith.constant dense<0.000000e+00> : vector<8x32xf32>
    %23 = tpu.matmul %21, %22, %cst_12 {dimension_numbers = #tpu.dot_dimension_numbers<[1], [0], [0], [1], [0, 0, 1, 1], [], []>} : vector<8x16xf32>, vector<16x32xf32>, vector<8x32xf32> -> vector<8x32xf32>
    %24 = vector.extract_strided_slice %5 {offsets = [16, 0], sizes = [16, 32], strides = [1, 1]} : vector<32x32xf32> to vector<16x32xf32>
    %25 = arith.addf %1, %24 : vector<16x32xf32>
    %26 = math.tanh %25 : vector<16x32xf32>
    %cst_13 = arith.constant dense<0.000000e+00> : vector<8x16xf32>
    %27 = tpu.matmul %2, %26, %cst_13 {dimension_numbers = #tpu.dot_dimension_numbers<[1], [1], [0], [0], [0, 0, 1, 0], [], []>} : vector<8x32xf32>, vector<16x32xf32>, vector<8x16xf32> -> vector<8x16xf32>
    %28 = vector.broadcast %3 : vector<8x1xf32> to vector<8x16xf32>
    %29 = arith.addf %27, %28 : vector<8x16xf32>
    %cst_14 = arith.constant dense<0xFF800000> : vector<8xf32>
    %30 = vector.multi_reduction <maximumf>, %29, %cst_14 [1] : vector<8x16xf32> to vector<8xf32>
    %31 = vector.shape_cast %30 : vector<8xf32> to vector<8x1xf32>
    %32 = vector.broadcast %31 : vector<8x1xf32> to vector<8x16xf32>
    %33 = arith.subf %29, %32 : vector<8x16xf32>
    %34 = math.exp %33 : vector<8x16xf32>
    %cst_15 = arith.constant dense<0.000000e+00> : vector<8xf32>
    %35 = vector.multi_reduction <add>, %34, %cst_15 [1] : vector<8x16xf32> to vector<8xf32>
    %36 = vector.shape_cast %35 : vector<8xf32> to vector<8x1xf32>
    %37 = tpu.reciprocal %36 {approx = true} : vector<8x1xf32> -> vector<8x1xf32>
    %38 = vector.broadcast %37 : vector<8x1xf32> to vector<8x16xf32>
    %39 = arith.mulf %34, %38 : vector<8x16xf32>
    %40 = vector.extract_strided_slice %0 {offsets = [16, 0], sizes = [16, 32], strides = [1, 1]} : vector<32x32xf32> to vector<16x32xf32>
    %cst_16 = arith.constant dense<0.000000e+00> : vector<8x32xf32>
    %41 = tpu.matmul %39, %40, %cst_16 {dimension_numbers = #tpu.dot_dimension_numbers<[1], [0], [0], [1], [0, 0, 1, 1], [], []>} : vector<8x16xf32>, vector<16x32xf32>, vector<8x32xf32> -> vector<8x32xf32>
    %42 = tpu.concatenate %23, %41 in 0 : vector<8x32xf32>, vector<8x32xf32> -> vector<16x32xf32>
    %c0_17 = arith.constant 0 : index
    %c0_18 = arith.constant 0 : index
    %43 = vector.load %arg6[%c0_17, %c0_18] : memref<32x128xf32, #tpu.memory_space<vmem>>, vector<32x128xf32>
    %cst_19 = arith.constant dense<0.000000e+00> : vector<16x128xf32>
    %44 = tpu.matmul %42, %43, %cst_19 {dimension_numbers = #tpu.dot_dimension_numbers<[1], [0], [0], [1], [0, 0, 1, 1], [], []>} : vector<16x32xf32>, vector<32x128xf32>, vector<16x128xf32> -> vector<16x128xf32>
    %c0_20 = arith.constant 0 : index
    %c0_21 = arith.constant 0 : index
    %45 = vector.load %arg7[%c0_20, %c0_21] : memref<1x128xf32, #tpu.memory_space<vmem>>, vector<1x128xf32>
    %46 = vector.broadcast %45 : vector<1x128xf32> to vector<16x128xf32>
    %47 = arith.addf %44, %46 : vector<16x128xf32>
    %c0_22 = arith.constant 0 : index
    %c0_23 = arith.constant 0 : index
    %48 = vector.load %arg8[%c0_22, %c0_23] : memref<16x128xf32, #tpu.memory_space<vmem>>, vector<16x128xf32>
    tpu.vector_store %arg8[%c0_22, %c0_23], %47 {strides = array<i32>} : memref<16x128xf32, #tpu.memory_space<vmem>>, vector<16x128xf32>,
    return
  }
  func.func @transform_0(%arg0: i32) -> (i32, i32) {
    %c0_i32 = arith.constant 0 : i32
    %c0_i32_0 = arith.constant 0 : i32
    return %arg0, %c0_i32 : i32, i32
  }
  func.func @transform_1(%arg0: i32) -> (i32, i32) {
    %c0_i32 = arith.constant 0 : i32
    %c0_i32_0 = arith.constant 0 : i32
    %c0_i32_1 = arith.constant 0 : i32
    return %c0_i32, %c0_i32_0 : i32, i32
  }
  func.func @transform_2(%arg0: i32) -> (i32, i32) {
    %c0_i32 = arith.constant 0 : i32
    %c0_i32_0 = arith.constant 0 : i32
    %c0_i32_1 = arith.constant 0 : i32
    return %c0_i32, %c0_i32_0 : i32, i32
  }
  func.func @transform_3(%arg0: i32) -> (i32, i32) {
    %c0_i32 = arith.constant 0 : i32
    %c0_i32_0 = arith.constant 0 : i32
    %c0_i32_1 = arith.constant 0 : i32
    return %c0_i32, %c0_i32_0 : i32, i32
  }
  func.func @transform_4(%arg0: i32) -> (i32, i32) {
    %c0_i32 = arith.constant 0 : i32
    %c0_i32_0 = arith.constant 0 : i32
    %c0_i32_1 = arith.constant 0 : i32
    return %c0_i32, %c0_i32_0 : i32, i32
  }
  func.func @transform_5(%arg0: i32) -> (i32, i32) {
    %c0_i32 = arith.constant 0 : i32
    %c0_i32_0 = arith.constant 0 : i32
    %c0_i32_1 = arith.constant 0 : i32
    return %c0_i32, %c0_i32_0 : i32, i32
  }
  func.func @transform_6(%arg0: i32) -> (i32, i32) {
    %c0_i32 = arith.constant 0 : i32
    %c0_i32_0 = arith.constant 0 : i32
    %c0_i32_1 = arith.constant 0 : i32
    return %c0_i32, %c0_i32_0 : i32, i32
  }
  func.func @transform_7(%arg0: i32) -> (i32, i32) {
    %c0_i32 = arith.constant 0 : i32
    %c0_i32_0 = arith.constant 0 : i32
    return %arg0, %c0_i32 : i32, i32
  }
}

</mosaic_0001>

<bundles_post_ra>
// kernel: tpu_custom_call.1
= control target key start
LH: loop header
LB: loop body
LE: loop exit
PB: predicated region body
PF: predicated region fallthrough
CT: control target
= control target key end

     0   :  { %12 = vsyncpa [#allocation3], 0  ;;  %s1002_s0 = inlined_call_operand.hbm [shape: f32[32,32], index: 0, kind: input, shape index: {}]   ;;  %s1003_s1 = inlined_call_operand.hbm [shape: f32[16,32], index: 1, kind: input, shape index: {}]   ;;  %s1004_s2 = inlined_call_operand.hbm [shape: f32[32,32], index: 2, kind: input, shape index: {}]   ;;  %s1005_s3 = inlined_call_operand.vmem [shape: f32[8,32], index: 3, kind: input, shape index: {}]   ;;  %s1006_s4 = inlined_call_operand.vmem [shape: f32[8,1], index: 4, kind: input, shape index: {}]   ;;  %s1007_s5 = inlined_call_operand.hbm [shape: f32[32,128], index: 5, kind: input, shape index: {}]   ;;  %s1008_s6 = inlined_call_operand.vmem [shape: f32[1,128], index: 6, kind: input, shape index: {}]   ;;  %s1009_s7 = inlined_call_operand.hbm [shape: f32[16,128], index: 7, kind: output, shape index: {}]  }
   0x1   :  { %13 = vsyncpa [#allocation6], 0 }
   0x2   :  { %14 = vsyncpa [#allocation9], 0 }
   0x3   :  { %15 = vsyncpa [#allocation4], 0  ;;  %s871_s24 = smov [#allocation5]   ;;  %s872_s26 = smov [#allocation2]  }
   0x4   :  { %s33_s25 = sshll.u32 %s871_s24, 4  ;;  %s21_s27 = sshll.u32 %s872_s26, 4  ;;  %s34_s25 = int_to_ptr.vmem [resolvable:$true] %s33_s25  ;;  %s22_s27 = int_to_ptr.vmem [resolvable:$true] %s21_s27 }
   0x5   :  { %s771_s28 = scalar_lea.vmem %s34_s25, 256  ;;  %p776_p1 = scmp.lt.s32.totalorder %s34_s25, %s34_s25 }
   0x6   :  { %p772_p0 = scmp.ne.s32.totalorder %s34_s25, %s771_s28  ;;  %p777_p2 = scmp.lt.s32.totalorder %s771_s28, %s771_s28 }
   0x8   :  { %p778_p3 = por %p777_p2, %p776_p1 }
   0xa   :  { %p779_p4 = pnand %p778_p3, %p772_p0 }
   0xc   :  { %782 = shalt.err (!%p779_p4)
}
   0xd   :  { %s873_s29 = smov 128   ;;  %s874_s30 = smov 8  }
   0xe   :  { %39 = dma.hbm_to_vmem [thread:$0]  %s1003_s1, 256, %s34_s25, [#allocation6], %s873_s29, %s873_s29, %s874_s30  }
   0xf   :  { %s791_s10 = scalar_lea.vmem %s22_s27, 512  ;;  %p796_p6 = scmp.lt.s32.totalorder %s22_s27, %s22_s27 }
  0x10   :  { %p792_p5 = scmp.ne.s32.totalorder %s22_s27, %s791_s10  ;;  %p797_p7 = scmp.lt.s32.totalorder %s791_s10, %s791_s10 }
  0x12   :  { %p798_p8 = por %p797_p7, %p796_p6 }
  0x14   :  { %p799_p9 = pnand %p798_p8, %p792_p5 }
  0x16   :  { %802 = shalt.err (!%p799_p9)
}
  0x17   :  { %27 = dma.hbm_to_vmem [thread:$0]  %s1002_s0, 512, %s22_s27, [#allocation3], %s873_s29, %s873_s29, %s874_s30  }
  0x18   :  { %s875_s13 = smov [#allocation7]   ;;  %s876_s15 = smov [#allocation8]  }
  0x19   :  { %s45_s14 = sshll.u32 %s875_s13, 4  ;;  %s61_s16 = sshll.u32 %s876_s15, 4  ;;  %s46_s14 = int_to_ptr.vmem [resolvable:$true] %s45_s14  ;;  %s62_s16 = int_to_ptr.vmem [resolvable:$true] %s61_s16 }
  0x1a   :  { %s811_s1 = scalar_lea.vmem %s46_s14, 512  ;;  %p816_p11 = scmp.lt.s32.totalorder %s46_s14, %s46_s14 }
  0x1b   :  { %p812_p10 = scmp.ne.s32.totalorder %s46_s14, %s811_s1  ;;  %p817_p12 = scmp.lt.s32.totalorder %s811_s1, %s811_s1 }
  0x1d   :  { %p818_p13 = por %p817_p12, %p816_p11 }
  0x1f   :  { %p819_p0 = pnand %p818_p13, %p812_p10 }
  0x21   :  { %822 = shalt.err (!%p819_p0)
}
  0x22   :  { %51 = dma.hbm_to_vmem [thread:$0]  %s1004_s2, 512, %s46_s14, [#allocation6], %s873_s29, %s873_s29, %s874_s30  }
  0x23   :  { %s831_s0 = scalar_lea.vmem %s62_s16, 512  ;;  %p836_p2 = scmp.lt.s32.totalorder %s62_s16, %s62_s16 }
  0x24   :  { %p832_p1 = scmp.ne.s32.totalorder %s62_s16, %s831_s0  ;;  %p837_p3 = scmp.lt.s32.totalorder %s831_s0, %s831_s0 }
  0x26   :  { %p838_p4 = por %p837_p3, %p836_p2 }
  0x28   :  { %p839_p5 = pnand %p838_p4, %p832_p1 }
  0x2a   :  { %842 = shalt.err (!%p839_p5)
}
  0x2b   :  { %67 = dma.hbm_to_vmem [thread:$0]  %s1007_s5, 512, %s62_s16, [#allocation9], %s873_s29, %s873_s29, %s874_s30  }
  0x2c   :  { %863 = dma.done.wait [#allocation3], 512  }
  0x2d   :  { %864 = vsyncadd [#allocation3], 4294966784 }
  0x2e   :  { %865 = dma.done.wait [#allocation6], 768  }
  0x2f   :  { %866 = vsyncadd [#allocation6], 4294966528 }
  0x30   :  { %867 = dma.done.wait [#allocation9], 512  }
  0x31   :  { %868 = vsyncadd [#allocation9], 4294966784  ;;  %vm94_vm0 = vcmask 261120   ;;  %v93_v0 = vld [vmem:[#allocation7 + $0x18] sm:$0xff]  ;;  %v92_v1 = vld [vmem:[#allocation7 + $0x10] sm:$0xff]  ;;  %v877_v8 = vmov 0.0  }
  0x32   :  { %683 = vmatprep.subr.mxu0 %v93_v0  ;;  %v82_v2 = vld [vmem:[#allocation2] sm:$0xff]  ;;  %v91_v3 = vld [vmem:[#allocation7 + $0x8] sm:$0xff]  ;;  %v90_v4 = vld [vmem:[#allocation7] sm:$0xff]  ;;  %697 = vmatprep.subr.mxu1 %v877_v8  ;;  %vm878_vm1 = vmmov 0   ;;  %v879_v10 = vmov 0   ;;  %vm280_vm2 = vcmask 130048  }
  0x33   :  { %684 = vmatpush3.msra.mxu0 %v93_v0  ;;  %691 = vmatprep.mubr.msk.f32.mxu0 %vm94_vm0, %v82_v2  ;;  %v83_v5 = vld [vmem:[#allocation2 + $0x8] sm:$0xff]  ;;  %v946_v6 = vld [vmem:[#allocation2 + $0x10] sm:$0xff]  ;;  %v951_v7 = vld [vmem:[#allocation2 + $0x18] sm:$0xff]  ;;  %s880_s23 = smov [#allocation10]  }
  0x34   :  { %685 = vmatprep.subr.mxu0 %v92_v1  ;;  %701 = vmatprep.mubr.msk.f32.mxu1 %vm878_vm1, %v877_v8  ;;  %v89_v9 = vld [vmem:[%s1006_s4] sm:$0xff]  ;;  %v87_v11 = vld [vmem:[#allocation5 + $0x8] sm:$0xff]  ;;  %v530_v53 = vld [vmem:[#allocation8 + $0x8] sm:$0xff]  ;;  %s628_s24 = sshll.u32 %s880_s23, 4  ;;  %s629_s24 = int_to_ptr.vmem [resolvable:$true] %s628_s24 }
  0x35   :  { %686 = vmatpush3.msra.mxu0 %v92_v1  ;;  %746 = vset.pattern.permute.xlu0 %v879_v10  ;;  %v86_v13 = vld [vmem:[#allocation5] sm:$0xff]  ;;  %v532_v45 = vld [vmem:[#allocation8 + $0x18] sm:$0xff]  ;;  %v529_v54 = vld [vmem:[#allocation8] sm:$0xff]  ;;  %s843_s25 = scalar_lea.vmem %s629_s24, 256  ;;  %p848_p7 = scmp.lt.s32.totalorder %s629_s24, %s629_s24 }
  0x36   :  { %687 = vmatprep.subr.mxu0 %v91_v3  ;;  %198 = vperm.xlu0 %746, %v89_v9   ;;  %v88_v24 = vld [vmem:[%s1005_s3] sm:$0xff]  ;;  %p844_p6 = scmp.ne.s32.totalorder %s629_s24, %s843_s25  ;;  %p849_p8 = scmp.lt.s32.totalorder %s843_s25, %s843_s25 }
  0x37   :  { %688 = vmatpush3.msra.mxu0 %v91_v3  ;;  %v531_v46 = vld [vmem:[#allocation8 + $0x10] sm:$0xff] }
  0x38   :  { %689 = vmatprep.subr.mxu0 %v90_v4  ;;  %v654_v59 = vld [vmem:[%s1008_s6] ss:$0 sm:$0xff]  ;;  %p850_p9 = por %p849_p8, %p848_p7 }
  0x39   :  { %690 = vmatpush3.msra.mxu0 %v90_v4 }
  0x3a   :  { %692 = vmatmul.mubr.msk.f32.vlgmr.msra.gmra.mxu0 %vm94_vm0, %v83_v5  ;;  %711 = vmatprep.subr.mxu0 %v877_v8  ;;  %p851_p10 = pnand %p850_p9, %p844_p6 }
  0x3b   :  { %694 = vmatprep.mubr.msk.f32.mxu0 %vm94_vm0, %v946_v6 }
  0x3e   :  { %695 = vmatmul.mubr.msk.f32.gmra.mxu0 %vm94_vm0, %v951_v7 }
  0x3f   :  { %715 = vmatprep.mubr.msk.f32.mxu0 %vm878_vm1, %v877_v8 }
  0xb1   :  { %v199_v26 = vpop.permute.xlu0 %198 }
  0xfa   :  { %v693_v12 = vpop.f32.mrf.mxu0 }
  0xfb   :  { %v193_v14 = vadd.f32 %v693_v12, %v87_v11 }
  0xfc   :  { %v173_v15 = vpop.f32.mrf.mxu0 }
  0xfd   :  { %747 = vtanh.f32 %v193_v14  ;;  %v192_v16 = vadd.f32 %v173_v15, %v86_v13 }
  0xfe   :  { %v696_v17 = vpop.f32.mrf.mxu0 }
  0xff   :  { %v366_v18 = vadd.f32 %v696_v17, %v87_v11  ;;  %749 = vtanh.f32 %v192_v16 }
 0x100   :  { %v183_v19 = vpop.f32.mrf.mxu0 }
 0x101   :  { %751 = vtanh.f32 %v366_v18  ;;  %v365_v20 = vadd.f32 %v183_v19, %v86_v13 }
 0x103   :  { %753 = vtanh.f32 %v365_v20 }
 0x10a   :  { %v748_v21 = vpop.eup %747 }
 0x10b   :  { %698 = vmatpush3.xpose.msk.msra.mxu1 %vm94_vm0, %v748_v21 }
 0x10c   :  { %699 = vmatprep.subr.mxu1 %v877_v8  ;;  %v750_v22 = vpop.eup %749 }
 0x10e   :  { %v752_v23 = vpop.eup %751 }
 0x10f   :  { %700 = vmatpush3.xpose.msk.msra.mxu1 %vm94_vm0, %v750_v22  ;;  %712 = vmatpush3.xpose.msk.msra.mxu0 %vm94_vm0, %v752_v23 }
 0x110   :  { %713 = vmatprep.subr.mxu0 %v877_v8  ;;  %704 = vmatprep.subr.mxu1 %v877_v8  ;;  %v754_v25 = vpop.eup %753 }
 0x112   :  { %702 = vmatmul.mubr.msk.f32.vlgmr.msra.gmra.mxu1 %vm94_vm0, %v88_v24 }
 0x113   :  { %714 = vmatpush3.xpose.msk.msra.mxu0 %vm94_vm0, %v754_v25  ;;  %705 = vmatpush3.msra.mxu1 %v83_v5 }
 0x114   :  { %706 = vmatprep.subr.mxu1 %v877_v8  ;;  %708 = vmatprep.mubr.msk.f32.mxu1 %vm878_vm1, %v877_v8 }
 0x115   :  { %707 = vmatpush3.msra.mxu1 %v82_v2  ;;  %725 = vmatprep.subr.mxu0 %v532_v45 }
 0x116   :  { %716 = vmatmul.mubr.msk.f32.vlgmr.msra.gmra.mxu0 %vm94_vm0, %v88_v24  ;;  %718 = vmatprep.subr.mxu1 %v877_v8 }
 0x117   :  { %726 = vmatpush3.msra.mxu0 %v532_v45 }
 0x118   :  { %727 = vmatprep.subr.mxu0 %v531_v46 }
 0x119   :  { %728 = vmatpush3.msra.mxu0 %v531_v46 }
 0x11a   :  { %729 = vmatprep.subr.mxu0 %v530_v53 }
 0x11b   :  { %730 = vmatpush3.msra.mxu0 %v530_v53 }
 0x11c   :  { %731 = vmatprep.subr.mxu0 %v529_v54 }
 0x11d   :  { %732 = vmatpush3.msra.mxu0 %v529_v54 }
 0x1d2   :  { %v276_v27 = vpop.f32.mrf.mxu1 }
 0x1d3   :  { %v277_v28 = vadd.f32 %v276_v27, %v199_v26 }
 0x1d4   :  { %v703_v29 = vpop.f32.mrf.mxu1 }
 0x1d5   :  { %v281_v30 = vsel %vm280_vm2, %v277_v28, -inf }
 0x1d6   :  { %282 = vmax.xlane.f32.xlu0 %v281_v30  ;;  %v441_v31 = vpop.f32.mrf.mxu0 }
 0x1d7   :  { %v442_v32 = vadd.f32 %v441_v31, %v199_v26 }
 0x1d8   :  { %v717_v33 = vpop.f32.mrf.mxu0 }
 0x1d9   :  { %v445_v34 = vsel %vm280_vm2, %v442_v32, -inf }
 0x1da   :  { %446 = vmax.xlane.f32.xlu1 %v445_v34 }
 0x25f   :  { %v283_v35 = vpop.xlane.xlu0 %282 }
 0x260   :  { %v284_v36 = vsub.f32 %v277_v28, %v283_v35 }
 0x262   :  { %v285_v37 = vmul.f32 1.442695, %v284_v36 }
 0x263   :  { %v447_v38 = vpop.xlane.xlu1 %446 }
 0x264   :  { %755 = vpow2.f32 %v285_v37  ;;  %v448_v39 = vsub.f32 %v442_v32, %v447_v38 }
 0x266   :  { %v449_v40 = vmul.f32 1.442695, %v448_v39 }
 0x268   :  { %757 = vpow2.f32 %v449_v40 }
 0x271   :  { %v756_v41 = vpop.eup %755 }
 0x272   :  { %v287_v42 = vsel %vm280_vm2, %v756_v41, 0.0 }
 0x273   :  { %288 = vadd.xlane.f32.xlu1 %v287_v42 }
 0x275   :  { %v758_v43 = vpop.eup %757 }
 0x276   :  { %v451_v44 = vsel %vm280_vm2, %v758_v43, 0.0 }
 0x277   :  { %452 = vadd.xlane.f32.xlu1 %v451_v44 }
 0x2fc   :  { %v289_v47 = vpop.xlane.xlu1 %288 }
 0x2fd   :  { %759 = vrcp.f32 %v289_v47 }
 0x300   :  { %v453_v48 = vpop.xlane.xlu1 %452 }
 0x301   :  { %761 = vrcp.f32 %v453_v48 }
 0x30a   :  { %v760_v49 = vpop.eup %759 }
 0x30b   :  { %v291_v50 = vmul.f32 %v760_v49, %v756_v41 }
 0x30d   :  { %709 = vmatmul.mubr.msk.f32.vlgmr.msra.gmra.mxu1 %vm280_vm2, %v291_v50 }
 0x30e   :  { %v762_v51 = vpop.eup %761  ;;  %719 = vmatpush3.msra.mxu1 %v951_v7  ;;  %722 = vmatprep.mubr.msk.f32.mxu1 %vm878_vm1, %v877_v8 }
 0x30f   :  { %720 = vmatprep.subr.mxu1 %v877_v8  ;;  %v455_v52 = vmul.f32 %v762_v51, %v758_v43 }
 0x310   :  { %721 = vmatpush3.msra.mxu1 %v946_v6 }
 0x311   :  { %723 = vmatmul.mubr.msk.f32.vlgmr.msra.gmra.mxu1 %vm280_vm2, %v455_v52 }
 0x3cd   :  { %v361_v55 = vpop.f32.mrf.mxu1 }
 0x3ce   :  { %733 = vmatprep.mubr.msk.f32.mxu0 %vm94_vm0, %v361_v55 }
 0x3cf   :  { %v710_v56 = vpop.f32.mrf.mxu1 }
 0x3d1   :  { %v525_v57 = vpop.f32.mrf.mxu1 }
 0x3d2   :  { %734 = vmatmul.mubr.msk.f32.vlgmr.msra.gmra.mxu0 %vm94_vm0, %v525_v57 }
 0x3d3   :  { %v724_v58 = vpop.f32.mrf.mxu1 }
 0x492   :  { %v735_v60 = vpop.f32.mrf.mxu0 }
 0x493   :  { %v618_v61 = vadd.f32 %v735_v60, %v654_v59 }
 0x494   :  { %v612_v62 = vpop.f32.mrf.mxu0 }
 0x495   :  { %622 = vst [vmem:[#allocation10 + $0x8] sm:$0xff] %v618_v61  ;;  %v613_v63 = vadd.f32 %v654_v59, %v612_v62 }
 0x497   :  { %621 = vst [vmem:[#allocation10] sm:$0xff] %v613_v63 }
 0x498   :  { %854 = shalt.err (!%p851_p10)
}
 0x499   :  { %634 = dma.vmem_to_hbm [thread:$0]  %s629_s24, 256, %s1009_s7, [#allocation4], %s873_s29, %s873_s29, %s874_s30  }
 0x49a   :  { %869 = dma.done.wait [#allocation4], 256  }
 0x49b   :  { %870 = vsyncadd [#allocation4], 4294967040 }
 0x49c   :  { %638 = vsyncpa [#allocation3], 1 }
 0x49d   :  { %639 = vsyncpa [#allocation6], 1 }
 0x49e   :  { %640 = vsyncpa [#allocation9], 1 }
 0x49f   :  { %641 = vsyncpa [#allocation4], 1 }

</bundles_post_ra>
